<compile_context>
chip_gen: v7x
topology: tpu7x:2x2x1
jax: 0.10.0
libtpu: 0.0.40
codegen_flags: <defaults>
</compile_context>

<pallas_src>
import functools

import jax
import jax.numpy as jnp
from jax.experimental import pallas as pl
from jax.experimental.pallas import tpu as pltpu


def lstm_corona_kernel(x_ref, w_ref, o_ref, *, seq_len, in_size, h_pad):
    G4 = 4 * h_pad            # packed gate width (128 for h_size=30)
    G3 = 3 * h_pad

    # Packed parameter slab layout (see _pack_params).
    wih_t = w_ref[0:in_size, :]            # (in_size, 4*h_pad)  == W_ih^T (reordered/padded, i/f/o pre-scaled by 0.5)
    b     = w_ref[8:9, :]                  # (1, 4*h_pad)        == b_ih + b_hh (same layout / scaling)
    fc_w  = w_ref[9:10, :]                 # (1, 4*h_pad)        lanes [0:h_size) = fc weight
    fc_b  = w_ref[10:11, 0:1]              # (1, 1)
    whh_t = w_ref[16:16 + h_pad, :]        # (h_pad, 4*h_pad)    == W_hh^T (reordered/padded, i/f/o pre-scaled by 0.5)

    # --- Input projection for ALL timesteps, off the recurrent critical path.
    x = x_ref[...]                          # (seq_len, in_size)
    if in_size == 1:
        gates_x = x * wih_t + b             # (seq_len, 4*h_pad), pure VPU broadcast
    else:
        gates_x = jnp.dot(x, wih_t, preferred_element_type=jnp.float32) + b

    # --- One LSTM cell step.  gates holds (i,f,o) preactivations already
    #     scaled by 0.5 and the g preactivation unscaled, so a single tanh
    #     over the full 128-lane vreg yields all four gates:
    #        sigmoid(z) = 0.5 * tanh(z/2) + 0.5   (i, f, o lanes)
    #        tanh(z)                              (g lanes)
    def step(gates, h, c):
        t_all = jnp.tanh(gates)                  # 1 EUP launch, 128 lanes
        ifo = 0.5 * t_all[:, :G3] + 0.5          # 1 VPU fma over 96 lanes
        i_g = ifo[:, 0:h_pad]
        f_g = ifo[:, h_pad:2 * h_pad]
        o_g = ifo[:, 2 * h_pad:G3]
        g_g = t_all[:, G3:G4]
        c = f_g * c + i_g * g_g
        h = o_g * jnp.tanh(c)                    # 2nd (and last) EUP launch
        return h, c

    # --- Recurrence.  First step peeled: h0 == 0 -> skip recurrent matmul.
    h0 = jnp.zeros((1, h_pad), jnp.float32)
    c0 = jnp.zeros((1, h_pad), jnp.float32)
    h, c = step(gates_x[0:1, :], h0, c0)

    if seq_len <= 32:
        # Small static trip count: full unroll.
        for t in range(1, seq_len):
            gates = gates_x[t:t + 1, :] + jnp.dot(
                h, whh_t, preferred_element_type=jnp.float32)
            h, c = step(gates, h, c)
    else:
        # Large seq_len: bounded code size / vreg live ranges.
        def body(t, carry):
            h, c = carry
            gx = jax.lax.dynamic_slice_in_dim(gates_x, t, 1, axis=0)
            gates = gx + jnp.dot(h, whh_t, preferred_element_type=jnp.float32)
            return step(gates, h, c)
        h, c = jax.lax.fori_loop(1, seq_len, body, (h, c), unroll=True)

    # --- Final Linear on the last hidden state (== pred[-1]): VPU mul + lane reduce.
    pred = jnp.sum(h * fc_w[:, :h_pad], axis=-1, keepdims=True) + fc_b   # (1, 1)
    o_ref[...] = pred


def _reorder_pad_gates(w, h_size, h_pad, *, scale_ifo):
    """Split PyTorch gate blocks (i,f,g,o) along rows, reorder to (i,f,o,g),
    zero-pad each block from h_size to h_pad rows.  If scale_ifo, pre-scale
    the i/f/o blocks by 0.5 (tanh-only sigmoid formulation); scaling zeros
    keeps the padded lanes exactly zero."""
    i, f, g, o = jnp.split(w, 4, axis=0)
    if scale_ifo:
        i, f, o = 0.5 * i, 0.5 * f, 0.5 * o
    pad = [(0, h_pad - h_size), (0, 0)]
    return jnp.concatenate([jnp.pad(blk, pad) for blk in (i, f, o, g)], axis=0)


def _pack_params(params, h_pad):
    """Pack LSTM + Linear parameters into one (16 + h_pad, 4*h_pad) f32 slab.

      rows 0:in_size    W_ih^T   (gate order i,f,o,g; i/f/o pre-scaled 0.5; padded)
      row  8            b_ih + b_hh (same gate layout / scaling)
      row  9            fc weight in lanes [0:h_size)
      row  10, lane 0   fc bias
      rows 16:16+h_pad  W_hh^T   (same gate layout / scaling, hidden dim padded)
    """
    w_ih, w_hh, b_ih, b_hh, fc_w, fc_b = [p.astype(jnp.float32) for p in params]
    h_size = w_hh.shape[1]
    in_size = w_ih.shape[1]
    G4 = 4 * h_pad

    w_ih_g = _reorder_pad_gates(w_ih, h_size, h_pad, scale_ifo=True)     # (4*h_pad, in)
    w_hh_g = _reorder_pad_gates(w_hh, h_size, h_pad, scale_ifo=True)     # (4*h_pad, h)
    w_hh_g = jnp.pad(w_hh_g, [(0, 0), (0, h_pad - h_size)])              # (4*h_pad, h_pad)
    b_g = _reorder_pad_gates((b_ih + b_hh)[:, None], h_size, h_pad,
                             scale_ifo=True)                             # (4*h_pad, 1)

    slab = jnp.zeros((16 + h_pad, G4), jnp.float32)
    slab = slab.at[0:in_size, :].set(w_ih_g.T)
    slab = slab.at[8, :].set(b_g[:, 0])
    slab = slab.at[9, :h_size].set(fc_w[0])
    slab = slab.at[10, 0].set(fc_b[0])
    slab = slab.at[16:16 + h_pad, :].set(w_hh_g.T)
    return slab


def build_lstm_corona_forward(params, seq_len):
    """Packs weights once (device-resident) and returns a jitted forward:
       forward(sequence_data: (seq_len,) f32) -> (out_size,) f32 == pred[-1]."""
    w_ih, w_hh, b_ih, b_hh, fc_w, fc_b = params
    in_size = w_ih.shape[1]
    h_size = w_hh.shape[1]
    out_size = fc_w.shape[0]
    assert in_size <= 8, "packed-slab layout assumes in_size <= 8"
    assert out_size == 1, "LSTM_Corona uses out_size == 1"

    h_pad = ((h_size + 31) // 32) * 32          # 30 -> 32: gates fill one 128-lane vreg

    # Pack ONCE; keep on device so per-call work is just the x DMA + kernel.
    slab = jax.device_put(_pack_params(params, h_pad))

    kernel = functools.partial(lstm_corona_kernel, seq_len=seq_len,
                               in_size=in_size, h_pad=h_pad)
    vmem_spec = pl.BlockSpec(memory_space=pltpu.MemorySpace.VMEM)
    call = pl.pallas_call(
        kernel,
        out_shape=jax.ShapeDtypeStruct((1, out_size), jnp.float32),
        in_specs=[vmem_spec, vmem_spec],     # whole arrays in VMEM; no grid
        out_specs=vmem_spec,
    )

    @jax.jit
    def forward(sequence_data):
        x = sequence_data.reshape(seq_len, in_size).astype(jnp.float32)
        return call(x, slab).reshape(out_size)

    return forward


def init_params(key, in_size=1, h_size=30, out_size=1):
    """Deterministic init mimicking PyTorch defaults: U(-1/sqrt(h), 1/sqrt(h))."""
    ks = jax.random.split(key, 6)
    k_lstm = 1.0 / jnp.sqrt(jnp.float32(h_size))
    k_fc = 1.0 / jnp.sqrt(jnp.float32(h_size))
    w_ih = jax.random.uniform(ks[0], (4 * h_size, in_size), jnp.float32, -k_lstm, k_lstm)
    w_hh = jax.random.uniform(ks[1], (4 * h_size, h_size), jnp.float32, -k_lstm, k_lstm)
    b_ih = jax.random.uniform(ks[2], (4 * h_size,), jnp.float32, -k_lstm, k_lstm)
    b_hh = jax.random.uniform(ks[3], (4 * h_size,), jnp.float32, -k_lstm, k_lstm)
    fc_w = jax.random.uniform(ks[4], (out_size, h_size), jnp.float32, -k_fc, k_fc)
    fc_b = jax.random.uniform(ks[5], (out_size,), jnp.float32, -k_fc, k_fc)
    return (w_ih, w_hh, b_ih, b_hh, fc_w, fc_b)


def _reference_forward(sequence_data, params):
    """Pure-JAX reference of the same PyTorch forward (for sanity checking)."""
    w_ih, w_hh, b_ih, b_hh, fc_w, fc_b = params
    h_size = w_hh.shape[1]
    h = jnp.zeros((1, h_size), jnp.float32)
    c = jnp.zeros((1, h_size), jnp.float32)
    x = sequence_data.reshape(-1, 1).astype(jnp.float32)
    for t in range(x.shape[0]):
        gates = x[t:t + 1] @ w_ih.T + h @ w_hh.T + b_ih + b_hh
        i_g = jax.nn.sigmoid(gates[:, 0 * h_size:1 * h_size])
        f_g = jax.nn.sigmoid(gates[:, 1 * h_size:2 * h_size])
        g_g = jnp.tanh(gates[:, 2 * h_size:3 * h_size])
        o_g = jax.nn.sigmoid(gates[:, 3 * h_size:4 * h_size])
        c = f_g * c + i_g * g_g
        h = o_g * jnp.tanh(c)
    return (h @ fc_w.T + fc_b).reshape(-1)


if __name__ == "__main__":
    key = jax.random.PRNGKey(0)
    k_param, k_data = jax.random.split(key)

    in_size, h_size, out_size = 1, 30, 1
    seq_len = 8

    params = init_params(k_param, in_size, h_size, out_size)
    sequence_data = jax.random.normal(k_data, (seq_len,), jnp.float32)

    forward = build_lstm_corona_forward(params, seq_len)   # packs slab once, jits wrapper
    pred = jax.block_until_ready(forward(sequence_data))
    # Second call exercises the cached (already-compiled, slab-resident) path.
    pred = jax.block_until_ready(forward(sequence_data))

    ref = _reference_forward(sequence_data, params)
    assert pred.shape == (out_size,)
    assert jnp.allclose(pred, ref, atol=3e-5, rtol=3e-5), (pred, ref)

    print("KERNEL_OK")
</pallas_src>

<mosaic_0001>
module attributes {stable_mosaic.version = 11 : i64} {
  func.func @lstm_corona_kernel(%arg0: memref<8x1xf32, #tpu.memory_space<vmem>>, %arg1: memref<48x128xf32, #tpu.memory_space<vmem>>, %arg2: memref<1x1xf32, #tpu.memory_space<vmem>>) attributes {dimension_semantics = [], scalar_prefetch = 0 : i64, scratch_operands = 0 : i64, tpu.core_type = #tpu.core_type<tc>} {
    %c0 = arith.constant 0 : index
    %c0_0 = arith.constant 0 : index
    %0 = vector.load %arg1[%c0, %c0_0] : memref<48x128xf32, #tpu.memory_space<vmem>>, vector<1x128xf32>
    %c8 = arith.constant 8 : index
    %c0_1 = arith.constant 0 : index
    %1 = vector.load %arg1[%c8, %c0_1] : memref<48x128xf32, #tpu.memory_space<vmem>>, vector<1x128xf32>
    %c9 = arith.constant 9 : index
    %c0_2 = arith.constant 0 : index
    %2 = vector.load %arg1[%c9, %c0_2] : memref<48x128xf32, #tpu.memory_space<vmem>>, vector<1x128xf32>
    %c10 = arith.constant 10 : index
    %c0_3 = arith.constant 0 : index
    %3 = vector.load %arg1[%c10, %c0_3] : memref<48x128xf32, #tpu.memory_space<vmem>>, vector<1x1xf32>
    %c16 = arith.constant 16 : index
    %c0_4 = arith.constant 0 : index
    %4 = vector.load %arg1[%c16, %c0_4] : memref<48x128xf32, #tpu.memory_space<vmem>>, vector<32x128xf32>
    %c0_5 = arith.constant 0 : index
    %c0_6 = arith.constant 0 : index
    %5 = vector.load %arg0[%c0_5, %c0_6] : memref<8x1xf32, #tpu.memory_space<vmem>>, vector<8x1xf32>
    %6 = vector.broadcast %5 : vector<8x1xf32> to vector<8x128xf32>
    %7 = vector.broadcast %0 : vector<1x128xf32> to vector<8x128xf32>
    %8 = arith.mulf %6, %7 : vector<8x128xf32>
    %9 = vector.broadcast %1 : vector<1x128xf32> to vector<8x128xf32>
    %10 = arith.addf %8, %9 : vector<8x128xf32>
    %cst = arith.constant 0.000000e+00 : f32
    %11 = vector.broadcast %cst : f32 to vector<1x32xf32>
    %12 = vector.extract_strided_slice %10 {offsets = [0, 0], sizes = [1, 128], strides = [1, 1]} : vector<8x128xf32> to vector<1x128xf32>
    %13 = math.tanh %12 : vector<1x128xf32>
    %14 = vector.extract_strided_slice %13 {offsets = [0, 0], sizes = [1, 96], strides = [1, 1]} : vector<1x128xf32> to vector<1x96xf32>
    %cst_7 = arith.constant 5.000000e-01 : f32
    %15 = vector.broadcast %cst_7 : f32 to vector<1x96xf32>
    %16 = arith.mulf %15, %14 : vector<1x96xf32>
    %cst_8 = arith.constant 5.000000e-01 : f32
    %17 = vector.broadcast %cst_8 : f32 to vector<1x96xf32>
    %18 = arith.addf %16, %17 : vector<1x96xf32>
    %19 = vector.extract_strided_slice %18 {offsets = [0, 0], sizes = [1, 32], strides = [1, 1]} : vector<1x96xf32> to vector<1x32xf32>
    %20 = vector.extract_strided_slice %18 {offsets = [0, 32], sizes = [1, 32], strides = [1, 1]} : vector<1x96xf32> to vector<1x32xf32>
    %21 = vector.extract_strided_slice %18 {offsets = [0, 64], sizes = [1, 32], strides = [1, 1]} : vector<1x96xf32> to vector<1x32xf32>
    %22 = vector.extract_strided_slice %13 {offsets = [0, 96], sizes = [1, 32], strides = [1, 1]} : vector<1x128xf32> to vector<1x32xf32>
    %23 = arith.mulf %20, %11 : vector<1x32xf32>
    %24 = arith.mulf %19, %22 : vector<1x32xf32>
    %25 = arith.addf %23, %24 : vector<1x32xf32>
    %26 = math.tanh %25 : vector<1x32xf32>
    %27 = arith.mulf %21, %26 : vector<1x32xf32>
    %28 = vector.extract_strided_slice %10 {offsets = [1, 0], sizes = [1, 128], strides = [1, 1]} : vector<8x128xf32> to vector<1x128xf32>
    %cst_9 = arith.constant dense<0.000000e+00> : vector<1x128xf32>
    %29 = tpu.matmul %27, %4, %cst_9 {dimension_numbers = #tpu.dot_dimension_numbers<[1], [0], [0], [1], [0, 0, 1, 1], [], []>} : vector<1x32xf32>, vector<32x128xf32>, vector<1x128xf32> -> vector<1x128xf32>
    %30 = arith.addf %28, %29 : vector<1x128xf32>
    %31 = math.tanh %30 : vector<1x128xf32>
    %32 = vector.extract_strided_slice %31 {offsets = [0, 0], sizes = [1, 96], strides = [1, 1]} : vector<1x128xf32> to vector<1x96xf32>
    %cst_10 = arith.constant 5.000000e-01 : f32
    %33 = vector.broadcast %cst_10 : f32 to vector<1x96xf32>
    %34 = arith.mulf %33, %32 : vector<1x96xf32>
    %cst_11 = arith.constant 5.000000e-01 : f32
    %35 = vector.broadcast %cst_11 : f32 to vector<1x96xf32>
    %36 = arith.addf %34, %35 : vector<1x96xf32>
    %37 = vector.extract_strided_slice %36 {offsets = [0, 0], sizes = [1, 32], strides = [1, 1]} : vector<1x96xf32> to vector<1x32xf32>
    %38 = vector.extract_strided_slice %36 {offsets = [0, 32], sizes = [1, 32], strides = [1, 1]} : vector<1x96xf32> to vector<1x32xf32>
    %39 = vector.extract_strided_slice %36 {offsets = [0, 64], sizes = [1, 32], strides = [1, 1]} : vector<1x96xf32> to vector<1x32xf32>
    %40 = vector.extract_strided_slice %31 {offsets = [0, 96], sizes = [1, 32], strides = [1, 1]} : vector<1x128xf32> to vector<1x32xf32>
    %41 = arith.mulf %38, %25 : vector<1x32xf32>
    %42 = arith.mulf %37, %40 : vector<1x32xf32>
    %43 = arith.addf %41, %42 : vector<1x32xf32>
    %44 = math.tanh %43 : vector<1x32xf32>
    %45 = arith.mulf %39, %44 : vector<1x32xf32>
    %46 = vector.extract_strided_slice %10 {offsets = [2, 0], sizes = [1, 128], strides = [1, 1]} : vector<8x128xf32> to vector<1x128xf32>
    %cst_12 = arith.constant dense<0.000000e+00> : vector<1x128xf32>
    %47 = tpu.matmul %45, %4, %cst_12 {dimension_numbers = #tpu.dot_dimension_numbers<[1], [0], [0], [1], [0, 0, 1, 1], [], []>} : vector<1x32xf32>, vector<32x128xf32>, vector<1x128xf32> -> vector<1x128xf32>
    %48 = arith.addf %46, %47 : vector<1x128xf32>
    %49 = math.tanh %48 : vector<1x128xf32>
    %50 = vector.extract_strided_slice %49 {offsets = [0, 0], sizes = [1, 96], strides = [1, 1]} : vector<1x128xf32> to vector<1x96xf32>
    %cst_13 = arith.constant 5.000000e-01 : f32
    %51 = vector.broadcast %cst_13 : f32 to vector<1x96xf32>
    %52 = arith.mulf %51, %50 : vector<1x96xf32>
    %cst_14 = arith.constant 5.000000e-01 : f32
    %53 = vector.broadcast %cst_14 : f32 to vector<1x96xf32>
    %54 = arith.addf %52, %53 : vector<1x96xf32>
    %55 = vector.extract_strided_slice %54 {offsets = [0, 0], sizes = [1, 32], strides = [1, 1]} : vector<1x96xf32> to vector<1x32xf32>
    %56 = vector.extract_strided_slice %54 {offsets = [0, 32], sizes = [1, 32], strides = [1, 1]} : vector<1x96xf32> to vector<1x32xf32>
    %57 = vector.extract_strided_slice %54 {offsets = [0, 64], sizes = [1, 32], strides = [1, 1]} : vector<1x96xf32> to vector<1x32xf32>
    %58 = vector.extract_strided_slice %49 {offsets = [0, 96], sizes = [1, 32], strides = [1, 1]} : vector<1x128xf32> to vector<1x32xf32>
    %59 = arith.mulf %56, %43 : vector<1x32xf32>
    %60 = arith.mulf %55, %58 : vector<1x32xf32>
    %61 = arith.addf %59, %60 : vector<1x32xf32>
    %62 = math.tanh %61 : vector<1x32xf32>
    %63 = arith.mulf %57, %62 : vector<1x32xf32>
    %64 = vector.extract_strided_slice %10 {offsets = [3, 0], sizes = [1, 128], strides = [1, 1]} : vector<8x128xf32> to vector<1x128xf32>
    %cst_15 = arith.constant dense<0.000000e+00> : vector<1x128xf32>
    %65 = tpu.matmul %63, %4, %cst_15 {dimension_numbers = #tpu.dot_dimension_numbers<[1], [0], [0], [1], [0, 0, 1, 1], [], []>} : vector<1x32xf32>, vector<32x128xf32>, vector<1x128xf32> -> vector<1x128xf32>
    %66 = arith.addf %64, %65 : vector<1x128xf32>
    %67 = math.tanh %66 : vector<1x128xf32>
    %68 = vector.extract_strided_slice %67 {offsets = [0, 0], sizes = [1, 96], strides = [1, 1]} : vector<1x128xf32> to vector<1x96xf32>
    %cst_16 = arith.constant 5.000000e-01 : f32
    %69 = vector.broadcast %cst_16 : f32 to vector<1x96xf32>
    %70 = arith.mulf %69, %68 : vector<1x96xf32>
    %cst_17 = arith.constant 5.000000e-01 : f32
    %71 = vector.broadcast %cst_17 : f32 to vector<1x96xf32>
    %72 = arith.addf %70, %71 : vector<1x96xf32>
    %73 = vector.extract_strided_slice %72 {offsets = [0, 0], sizes = [1, 32], strides = [1, 1]} : vector<1x96xf32> to vector<1x32xf32>
    %74 = vector.extract_strided_slice %72 {offsets = [0, 32], sizes = [1, 32], strides = [1, 1]} : vector<1x96xf32> to vector<1x32xf32>
    %75 = vector.extract_strided_slice %72 {offsets = [0, 64], sizes = [1, 32], strides = [1, 1]} : vector<1x96xf32> to vector<1x32xf32>
    %76 = vector.extract_strided_slice %67 {offsets = [0, 96], sizes = [1, 32], strides = [1, 1]} : vector<1x128xf32> to vector<1x32xf32>
    %77 = arith.mulf %74, %61 : vector<1x32xf32>
    %78 = arith.mulf %73, %76 : vector<1x32xf32>
    %79 = arith.addf %77, %78 : vector<1x32xf32>
    %80 = math.tanh %79 : vector<1x32xf32>
    %81 = arith.mulf %75, %80 : vector<1x32xf32>
    %82 = vector.extract_strided_slice %10 {offsets = [4, 0], sizes = [1, 128], strides = [1, 1]} : vector<8x128xf32> to vector<1x128xf32>
    %cst_18 = arith.constant dense<0.000000e+00> : vector<1x128xf32>
    %83 = tpu.matmul %81, %4, %cst_18 {dimension_numbers = #tpu.dot_dimension_numbers<[1], [0], [0], [1], [0, 0, 1, 1], [], []>} : vector<1x32xf32>, vector<32x128xf32>, vector<1x128xf32> -> vector<1x128xf32>
    %84 = arith.addf %82, %83 : vector<1x128xf32>
    %85 = math.tanh %84 : vector<1x128xf32>
    %86 = vector.extract_strided_slice %85 {offsets = [0, 0], sizes = [1, 96], strides = [1, 1]} : vector<1x128xf32> to vector<1x96xf32>
    %cst_19 = arith.constant 5.000000e-01 : f32
    %87 = vector.broadcast %cst_19 : f32 to vector<1x96xf32>
    %88 = arith.mulf %87, %86 : vector<1x96xf32>
    %cst_20 = arith.constant 5.000000e-01 : f32
    %89 = vector.broadcast %cst_20 : f32 to vector<1x96xf32>
    %90 = arith.addf %88, %89 : vector<1x96xf32>
    %91 = vector.extract_strided_slice %90 {offsets = [0, 0], sizes = [1, 32], strides = [1, 1]} : vector<1x96xf32> to vector<1x32xf32>
    %92 = vector.extract_strided_slice %90 {offsets = [0, 32], sizes = [1, 32], strides = [1, 1]} : vector<1x96xf32> to vector<1x32xf32>
    %93 = vector.extract_strided_slice %90 {offsets = [0, 64], sizes = [1, 32], strides = [1, 1]} : vector<1x96xf32> to vector<1x32xf32>
    %94 = vector.extract_strided_slice %85 {offsets = [0, 96], sizes = [1, 32], strides = [1, 1]} : vector<1x128xf32> to vector<1x32xf32>
    %95 = arith.mulf %92, %79 : vector<1x32xf32>
    %96 = arith.mulf %91, %94 : vector<1x32xf32>
    %97 = arith.addf %95, %96 : vector<1x32xf32>
    %98 = math.tanh %97 : vector<1x32xf32>
    %99 = arith.mulf %93, %98 : vector<1x32xf32>
    %100 = vector.extract_strided_slice %10 {offsets = [5, 0], sizes = [1, 128], strides = [1, 1]} : vector<8x128xf32> to vector<1x128xf32>
    %cst_21 = arith.constant dense<0.000000e+00> : vector<1x128xf32>
    %101 = tpu.matmul %99, %4, %cst_21 {dimension_numbers = #tpu.dot_dimension_numbers<[1], [0], [0], [1], [0, 0, 1, 1], [], []>} : vector<1x32xf32>, vector<32x128xf32>, vector<1x128xf32> -> vector<1x128xf32>
    %102 = arith.addf %100, %101 : vector<1x128xf32>
    %103 = math.tanh %102 : vector<1x128xf32>
    %104 = vector.extract_strided_slice %103 {offsets = [0, 0], sizes = [1, 96], strides = [1, 1]} : vector<1x128xf32> to vector<1x96xf32>
    %cst_22 = arith.constant 5.000000e-01 : f32
    %105 = vector.broadcast %cst_22 : f32 to vector<1x96xf32>
    %106 = arith.mulf %105, %104 : vector<1x96xf32>
    %cst_23 = arith.constant 5.000000e-01 : f32
    %107 = vector.broadcast %cst_23 : f32 to vector<1x96xf32>
    %108 = arith.addf %106, %107 : vector<1x96xf32>
    %109 = vector.extract_strided_slice %108 {offsets = [0, 0], sizes = [1, 32], strides = [1, 1]} : vector<1x96xf32> to vector<1x32xf32>
    %110 = vector.extract_strided_slice %108 {offsets = [0, 32], sizes = [1, 32], strides = [1, 1]} : vector<1x96xf32> to vector<1x32xf32>
    %111 = vector.extract_strided_slice %108 {offsets = [0, 64], sizes = [1, 32], strides = [1, 1]} : vector<1x96xf32> to vector<1x32xf32>
    %112 = vector.extract_strided_slice %103 {offsets = [0, 96], sizes = [1, 32], strides = [1, 1]} : vector<1x128xf32> to vector<1x32xf32>
    %113 = arith.mulf %110, %97 : vector<1x32xf32>
    %114 = arith.mulf %109, %112 : vector<1x32xf32>
    %115 = arith.addf %113, %114 : vector<1x32xf32>
    %116 = math.tanh %115 : vector<1x32xf32>
    %117 = arith.mulf %111, %116 : vector<1x32xf32>
    %118 = vector.extract_strided_slice %10 {offsets = [6, 0], sizes = [1, 128], strides = [1, 1]} : vector<8x128xf32> to vector<1x128xf32>
    %cst_24 = arith.constant dense<0.000000e+00> : vector<1x128xf32>
    %119 = tpu.matmul %117, %4, %cst_24 {dimension_numbers = #tpu.dot_dimension_numbers<[1], [0], [0], [1], [0, 0, 1, 1], [], []>} : vector<1x32xf32>, vector<32x128xf32>, vector<1x128xf32> -> vector<1x128xf32>
    %120 = arith.addf %118, %119 : vector<1x128xf32>
    %121 = math.tanh %120 : vector<1x128xf32>
    %122 = vector.extract_strided_slice %121 {offsets = [0, 0], sizes = [1, 96], strides = [1, 1]} : vector<1x128xf32> to vector<1x96xf32>
    %cst_25 = arith.constant 5.000000e-01 : f32
    %123 = vector.broadcast %cst_25 : f32 to vector<1x96xf32>
    %124 = arith.mulf %123, %122 : vector<1x96xf32>
    %cst_26 = arith.constant 5.000000e-01 : f32
    %125 = vector.broadcast %cst_26 : f32 to vector<1x96xf32>
    %126 = arith.addf %124, %125 : vector<1x96xf32>
    %127 = vector.extract_strided_slice %126 {offsets = [0, 0], sizes = [1, 32], strides = [1, 1]} : vector<1x96xf32> to vector<1x32xf32>
    %128 = vector.extract_strided_slice %126 {offsets = [0, 32], sizes = [1, 32], strides = [1, 1]} : vector<1x96xf32> to vector<1x32xf32>
    %129 = vector.extract_strided_slice %126 {offsets = [0, 64], sizes = [1, 32], strides = [1, 1]} : vector<1x96xf32> to vector<1x32xf32>
    %130 = vector.extract_strided_slice %121 {offsets = [0, 96], sizes = [1, 32], strides = [1, 1]} : vector<1x128xf32> to vector<1x32xf32>
    %131 = arith.mulf %128, %115 : vector<1x32xf32>
    %132 = arith.mulf %127, %130 : vector<1x32xf32>
    %133 = arith.addf %131, %132 : vector<1x32xf32>
    %134 = math.tanh %133 : vector<1x32xf32>
    %135 = arith.mulf %129, %134 : vector<1x32xf32>
    %136 = vector.extract_strided_slice %10 {offsets = [7, 0], sizes = [1, 128], strides = [1, 1]} : vector<8x128xf32> to vector<1x128xf32>
    %cst_27 = arith.constant dense<0.000000e+00> : vector<1x128xf32>
    %137 = tpu.matmul %135, %4, %cst_27 {dimension_numbers = #tpu.dot_dimension_numbers<[1], [0], [0], [1], [0, 0, 1, 1], [], []>} : vector<1x32xf32>, vector<32x128xf32>, vector<1x128xf32> -> vector<1x128xf32>
    %138 = arith.addf %136, %137 : vector<1x128xf32>
    %139 = math.tanh %138 : vector<1x128xf32>
    %140 = vector.extract_strided_slice %139 {offsets = [0, 0], sizes = [1, 96], strides = [1, 1]} : vector<1x128xf32> to vector<1x96xf32>
    %cst_28 = arith.constant 5.000000e-01 : f32
    %141 = vector.broadcast %cst_28 : f32 to vector<1x96xf32>
    %142 = arith.mulf %141, %140 : vector<1x96xf32>
    %cst_29 = arith.constant 5.000000e-01 : f32
    %143 = vector.broadcast %cst_29 : f32 to vector<1x96xf32>
    %144 = arith.addf %142, %143 : vector<1x96xf32>
    %145 = vector.extract_strided_slice %144 {offsets = [0, 0], sizes = [1, 32], strides = [1, 1]} : vector<1x96xf32> to vector<1x32xf32>
    %146 = vector.extract_strided_slice %144 {offsets = [0, 32], sizes = [1, 32], strides = [1, 1]} : vector<1x96xf32> to vector<1x32xf32>
    %147 = vector.extract_strided_slice %144 {offsets = [0, 64], sizes = [1, 32], strides = [1, 1]} : vector<1x96xf32> to vector<1x32xf32>
    %148 = vector.extract_strided_slice %139 {offsets = [0, 96], sizes = [1, 32], strides = [1, 1]} : vector<1x128xf32> to vector<1x32xf32>
    %149 = arith.mulf %146, %133 : vector<1x32xf32>
    %150 = arith.mulf %145, %148 : vector<1x32xf32>
    %151 = arith.addf %149, %150 : vector<1x32xf32>
    %152 = math.tanh %151 : vector<1x32xf32>
    %153 = arith.mulf %147, %152 : vector<1x32xf32>
    %154 = vector.extract_strided_slice %2 {offsets = [0, 0], sizes = [1, 32], strides = [1, 1]} : vector<1x128xf32> to vector<1x32xf32>
    %155 = arith.mulf %153, %154 : vector<1x32xf32>
    %cst_30 = arith.constant dense<0.000000e+00> : vector<1xf32>
    %156 = vector.multi_reduction <add>, %155, %cst_30 [1] : vector<1x32xf32> to vector<1xf32>
    %157 = vector.shape_cast %156 : vector<1xf32> to vector<1x1xf32>
    %158 = arith.addf %157, %3 : vector<1x1xf32>
    %c0_31 = arith.constant 0 : index
    %c0_32 = arith.constant 0 : index
    %159 = vector.load %arg2[%c0_31, %c0_32] : memref<1x1xf32, #tpu.memory_space<vmem>>, vector<1x1xf32>
    tpu.vector_store %arg2[%c0_31, %c0_32], %158 {strides = array<i32>} : memref<1x1xf32, #tpu.memory_space<vmem>>, vector<1x1xf32>,
    return
  }
}

</mosaic_0001>

<bundles_post_ra>
// kernel: forward.1
= control target key start
LH: loop header
LB: loop body
LE: loop exit
PB: predicated region body
PF: predicated region fallthrough
CT: control target
= control target key end

     0   :  { %7 = vsyncpa [#allocation3], 0  ;;  %s1228_s0 = inlined_call_operand.vmem [shape: f32[8,1], index: 0, kind: input, shape index: {}]   ;;  %s1229_s1 = inlined_call_operand.hbm [shape: f32[48,128], index: 1, kind: input, shape index: {}]   ;;  %s1230_s2 = inlined_call_operand.hbm [shape: f32[1,1], index: 2, kind: output, shape index: {}]  }
   0x1   :  { %8 = vsyncpa [#allocation4], 0  ;;  %s1080_s9 = smov [#allocation2]   ;;  %s1032_s13 = scalar_lea.hbm %s1229_s1, 768 }
   0x2   :  { %s16_s10 = sshll.u32 %s1080_s9, 4  ;;  %p1033_p0 = scmp.ne.s32.totalorder %s1229_s1, %s1032_s13  ;;  %s17_s10 = int_to_ptr.vmem [resolvable:$true] %s16_s10 }
   0x3   :  { %p1036_p1 = scmp.lt.u32.totalorder %s1032_s13, %s1229_s1 }
   0x5   :  { %p1038_p2 = pnand %p1036_p1, %p1033_p0 }
   0x7   :  { %1041 = shalt.err (!%p1038_p2)
}
   0x8   :  { %s1042_s18 = scalar_lea.vmem %s17_s10, 768  ;;  %p1047_p4 = scmp.lt.s32.totalorder %s17_s10, %s17_s10 }
   0x9   :  { %p1043_p3 = scmp.ne.s32.totalorder %s17_s10, %s1042_s18  ;;  %p1048_p5 = scmp.lt.s32.totalorder %s1042_s18, %s1042_s18 }
   0xb   :  { %p1049_p6 = por %p1048_p5, %p1047_p4 }
   0xd   :  { %p1050_p7 = pnand %p1049_p6, %p1043_p3 }
   0xf   :  { %1053 = shalt.err (!%p1050_p7)
}
  0x10   :  { %s1081_s19 = smov 128   ;;  %s1082_s20 = smov 8  }
  0x11   :  { %22 = dma.hbm_to_vmem [thread:$0]  %s1229_s1, 768, %s17_s10, [#allocation3], %s1081_s19, %s1081_s19, %s1082_s20  }
  0x12   :  { %1076 = dma.done.wait [#allocation3], 768  }
  0x13   :  { %1077 = vsyncadd [#allocation3], 4294966528  ;;  %v1083_v0 = vmov 0   ;;  %v34_v1 = vld [vmem:[%s1228_s0] sm:$0xff]  ;;  %v827_v4 = vld [vmem:[#allocation2 + $0x8] ss:$0 sm:$0xff] }
  0x14   :  { %999 = vset.pattern.permute.xlu0 %v1083_v0  ;;  %v826_v2 = vld [vmem:[#allocation2] ss:$0 sm:$0xff]  ;;  %s1084_s25 = smov 32   ;;  %v30_v15 = vld [vmem:[#allocation2 + $0x10] sm:$0xff]  ;;  %v31_v16 = vld [vmem:[#allocation2 + $0x18] sm:$0xff]  ;;  %v1085_v18 = vmov 0.0|0.0  }
  0x15   :  { %37 = vperm.xlu0 %999, %v34_v1   ;;  %v32_v17 = vld [vmem:[#allocation2 + $0x20] sm:$0xff]  ;;  %947 = vmatprep.subr.bf16.mxu0 %v1085_v18  ;;  %v1126_v19 = vpack.c.bf16 %v31_v16, %v30_v15  ;;  %v33_v20 = vld [vmem:[#allocation2 + $0x28] sm:$0xff]  ;;  %vm1086_vm0 = vmmov 0   ;;  %v1087_v21 = vmov 0.0   ;;  %s1088_s0 = smov 64   ;;  %vm73_vm1 = vcmask 261120  }
  0x16   :  { %953 = vmatprep.subr.bf16.mxu1 %v1085_v18  ;;  %878 = vmatprep.mubr.msk.f32.mxu0 %vm1086_vm0, %v1087_v21  ;;  %v1134_v22 = vpack.c.bf16 %v33_v20, %v32_v17  ;;  %vm801_vm2 = vcmask 261127   ;;  %s1089_s1 = smov [#allocation5]   ;;  %vm809_vm3 = vcmask 7175  }
  0x17   :  { %889 = vmatprep.mubr.msk.f32.mxu1 %vm1086_vm0, %v1087_v21  ;;  %949 = vmatpush3.bf16.msra.mxu0 %v1126_v19  ;;  %s817_s26 = sshll.u32 %s1089_s1, 4  ;;  %s818_s26 = int_to_ptr.vmem [resolvable:$true] %s817_s26 }
  0x18   :  { %955 = vmatpush3.bf16.msra.mxu1 %v1126_v19  ;;  %950 = vmatprep.subr.bf16.mxu0 %v1085_v18  ;;  %s1054_s27 = scalar_lea.vmem %s818_s26, 16  ;;  %s1058_s28 = scalar_lea.vmem %s818_s26, 32 }
  0x19   :  { %956 = vmatprep.subr.bf16.mxu1 %v1085_v18  ;;  %p1055_p8 = scmp.ne.s32.totalorder %s818_s26, %s1054_s27  ;;  %p1059_p9 = scmp.lt.s32.totalorder %s818_s26, %s818_s26 }
  0x1a   :  { %p1060_p10 = scmp.lt.s32.totalorder %s1058_s28, %s1054_s27 }
  0x1b   :  { %952 = vmatpush3.bf16.msra.mxu0 %v1134_v22 }
  0x1c   :  { %958 = vmatpush3.bf16.msra.mxu1 %v1134_v22  ;;  %959 = vmatprep.subr.bf16.mxu0 %v1085_v18  ;;  %p1061_p11 = por %p1060_p10, %p1059_p9 }
  0x1d   :  { %965 = vmatprep.subr.bf16.mxu1 %v1085_v18 }
  0x1e   :  { %p1062_p12 = pnand %p1061_p11, %p1055_p8 }
  0x94   :  { %v38_v3 = vpop.permute.xlu0 %37 }
  0x95   :  { %v44_v5 = vmul.f32 %v826_v2, %v38_v3 }
  0x97   :  { %v1120_v6 = vadd.f32 %v827_v4, %v44_v5 }
  0x99   :  { %1000 = vtanh.f32 %v1120_v6 }
  0xa3   :  { %v1001_v7 = vpop.eup %1000 }
  0xa4   :  { %55 = vrot.lane.b32.xlu0 %v1001_v7, %s1084_s25  ;;  %v51_v8 = vmul.f32 0.5, %v1001_v7 }
  0xa6   :  { %v52_v9 = vadd.f32 0.5, %v51_v8 }
  0xa8   :  { %v53_v12 = vmul.f32 0.0, %v52_v9 }
 0x116   :  { %v56_v10 = vpop.permute.xlu0 %55 }
 0x117   :  { %v58_v11 = vmul.f32 %v56_v10, %v52_v9 }
 0x119   :  { %60 = vrot.lane.b32.xlu1 %v58_v11, %s1084_s25 }
 0x18b   :  { %v61_v13 = vpop.permute.xlu1 %60 }
 0x18c   :  { %v63_v14 = vadd.f32 %v61_v13, %v53_v12 }
 0x18e   :  { %1002 = vtanh.f32 %v63_v14  ;;  %v154_v36 = vrot.slane %v63_v14, 7 }
 0x198   :  { %v1003_v23 = vpop.eup %1002 }
 0x199   :  { %66 = vrot.lane.b32.xlu1 %v1003_v23, %s1084_s25 }
 0x20b   :  { %v67_v24 = vpop.permute.xlu1 %66 }
 0x20c   :  { %v69_v25 = vmul.f32 %v67_v24, %v52_v9 }
 0x20e   :  { %71 = vrot.lane.b32.xlu0 %v69_v25, %s1088_s0 }
 0x280   :  { %v72_v26 = vpop.permute.xlu0 %71 }
 0x281   :  { %879 = vmatmul.mubr.msk.f32.vlgmr.msra.gmra.mrb[0].mxu0 %vm73_vm1, %v72_v26 }
 0x282   :  { %961 = vmatpush3.bf16.msra.mxu0 %v1126_v19  ;;  %900 = vmatprep.mubr.msk.f32.mxu0 %vm1086_vm0, %v1087_v21 }
 0x283   :  { %962 = vmatprep.subr.bf16.mxu0 %v1085_v18 }
 0x286   :  { %964 = vmatpush3.bf16.msra.mxu0 %v1134_v22 }
 0x287   :  { %971 = vmatprep.subr.bf16.mxu0 %v1085_v18 }
 0x354   :  { %v142_v27 = vpop.f32.mrb[0].mxu0 }
 0x355   :  { %v147_v28 = vrot.slane %v142_v27, 7  ;;  %v880_v29 = vpop.f32.mrb[1].mxu0 }
 0x357   :  { %v149_v30 = vadd.f32 %v147_v28, %v1120_v6 }
 0x359   :  { %1004 = vtanh.f32 %v149_v30 }
 0x363   :  { %v1005_v31 = vpop.eup %1004 }
 0x364   :  { %158 = vrot.lane.b32.xlu1 %v1005_v31, %s1084_s25  ;;  %v151_v32 = vmul.f32 0.5, %v1005_v31 }
 0x366   :  { %v152_v33 = vadd.f32 0.5, %v151_v32 }
 0x368   :  { %v156_v37 = vmul.f32 %v154_v36, %v152_v33 }
 0x3d6   :  { %v159_v34 = vpop.permute.xlu1 %158 }
 0x3d7   :  { %v161_v35 = vmul.f32 %v159_v34, %v152_v33 }
 0x3d9   :  { %163 = vrot.lane.b32.xlu0 %v161_v35, %s1084_s25 }
 0x44b   :  { %v164_v38 = vpop.permute.xlu0 %163 }
 0x44c   :  { %v166_v39 = vadd.f32 %v164_v38, %v156_v37 }
 0x44e   :  { %1006 = vtanh.f32 %v166_v39  ;;  %v257_v54 = vrot.slane %v166_v39, 7 }
 0x458   :  { %v1007_v40 = vpop.eup %1006 }
 0x459   :  { %169 = vrot.lane.b32.xlu1 %v1007_v40, %s1084_s25 }
 0x4cb   :  { %v170_v41 = vpop.permute.xlu1 %169 }
 0x4cc   :  { %v172_v42 = vmul.f32 %v170_v41, %v152_v33 }
 0x4ce   :  { %v174_v43 = vrot.slane %v172_v42, 1 }
 0x4d0   :  { %175 = vrot.lane.b32.xlu0 %v174_v43, %s1088_s0 }
 0x542   :  { %v176_v44 = vpop.permute.xlu0 %175 }
 0x543   :  { %890 = vmatmul.mubr.msk.f32.vlgmr.msra.gmra.mrb[0].mxu1 %vm73_vm1, %v176_v44 }
 0x544   :  { %967 = vmatpush3.bf16.msra.mxu1 %v1126_v19  ;;  %911 = vmatprep.mubr.msk.f32.mxu1 %vm1086_vm0, %v1087_v21 }
 0x545   :  { %968 = vmatprep.subr.bf16.mxu1 %v1085_v18 }
 0x548   :  { %970 = vmatpush3.bf16.msra.mxu1 %v1134_v22 }
 0x549   :  { %977 = vmatprep.subr.bf16.mxu1 %v1085_v18 }
 0x616   :  { %v245_v45 = vpop.f32.mrb[0].mxu1 }
 0x617   :  { %v250_v46 = vrot.slane %v245_v45, 6  ;;  %v891_v47 = vpop.f32.mrb[1].mxu1 }
 0x619   :  { %v252_v48 = vadd.f32 %v250_v46, %v1120_v6 }
 0x61b   :  { %1008 = vtanh.f32 %v252_v48 }
 0x625   :  { %v1009_v49 = vpop.eup %1008 }
 0x626   :  { %261 = vrot.lane.b32.xlu1 %v1009_v49, %s1084_s25  ;;  %v254_v50 = vmul.f32 0.5, %v1009_v49 }
 0x628   :  { %v255_v51 = vadd.f32 0.5, %v254_v50 }
 0x62a   :  { %v259_v55 = vmul.f32 %v257_v54, %v255_v51 }
 0x698   :  { %v262_v52 = vpop.permute.xlu1 %261 }
 0x699   :  { %v264_v53 = vmul.f32 %v262_v52, %v255_v51 }
 0x69b   :  { %266 = vrot.lane.b32.xlu0 %v264_v53, %s1084_s25 }
 0x70d   :  { %v267_v56 = vpop.permute.xlu0 %266 }
 0x70e   :  { %v269_v57 = vadd.f32 %v267_v56, %v259_v55 }
 0x710   :  { %1010 = vtanh.f32 %v269_v57  ;;  %v360_v9 = vrot.slane %v269_v57, 7 }
 0x71a   :  { %v1011_v58 = vpop.eup %1010 }
 0x71b   :  { %272 = vrot.lane.b32.xlu1 %v1011_v58, %s1084_s25 }
 0x78d   :  { %v273_v59 = vpop.permute.xlu1 %272 }
 0x78e   :  { %v275_v60 = vmul.f32 %v273_v59, %v255_v51 }
 0x790   :  { %v277_v61 = vrot.slane %v275_v60, 2 }
 0x792   :  { %278 = vrot.lane.b32.xlu0 %v277_v61, %s1088_s0 }
 0x804   :  { %v279_v62 = vpop.permute.xlu0 %278 }
 0x805   :  { %901 = vmatmul.mubr.msk.f32.vlgmr.msra.gmra.mrb[2].mxu0 %vm73_vm1, %v279_v62 }
 0x806   :  { %973 = vmatpush3.bf16.msra.mxu0 %v1126_v19  ;;  %922 = vmatprep.mubr.msk.f32.mxu0 %vm1086_vm0, %v1087_v21 }
 0x807   :  { %974 = vmatprep.subr.bf16.mxu0 %v1085_v18 }
 0x80a   :  { %976 = vmatpush3.bf16.msra.mxu0 %v1134_v22 }
 0x80b   :  { %983 = vmatprep.subr.bf16.mxu0 %v1085_v18 }
 0x8d8   :  { %v348_v63 = vpop.f32.mrb[2].mxu0 }
 0x8d9   :  { %v353_v0 = vrot.slane %v348_v63, 5  ;;  %v902_v1 = vpop.f32.mrb[3].mxu0 }
 0x8db   :  { %v355_v2 = vadd.f32 %v353_v0, %v1120_v6 }
 0x8dd   :  { %1012 = vtanh.f32 %v355_v2 }
 0x8e7   :  { %v1013_v3 = vpop.eup %1012 }
 0x8e8   :  { %364 = vrot.lane.b32.xlu1 %v1013_v3, %s1084_s25  ;;  %v357_v4 = vmul.f32 0.5, %v1013_v3 }
 0x8ea   :  { %v358_v5 = vadd.f32 0.5, %v357_v4 }
 0x8ec   :  { %v362_v10 = vmul.f32 %v360_v9, %v358_v5 }
 0x95a   :  { %v365_v7 = vpop.permute.xlu1 %364 }
 0x95b   :  { %v367_v8 = vmul.f32 %v365_v7, %v358_v5 }
 0x95d   :  { %369 = vrot.lane.b32.xlu0 %v367_v8, %s1084_s25 }
 0x9cf   :  { %v370_v11 = vpop.permute.xlu0 %369 }
 0x9d0   :  { %v372_v12 = vadd.f32 %v370_v11, %v362_v10 }
 0x9d2   :  { %1014 = vtanh.f32 %v372_v12  ;;  %v463_v31 = vrot.slane %v372_v12, 7 }
 0x9dc   :  { %v1015_v13 = vpop.eup %1014 }
 0x9dd   :  { %375 = vrot.lane.b32.xlu1 %v1015_v13, %s1084_s25 }
 0xa4f   :  { %v376_v14 = vpop.permute.xlu1 %375 }
 0xa50   :  { %v378_v15 = vmul.f32 %v376_v14, %v358_v5 }
 0xa52   :  { %v380_v16 = vrot.slane %v378_v15, 3 }
 0xa54   :  { %381 = vrot.lane.b32.xlu0 %v380_v16, %s1088_s0 }
 0xac6   :  { %v382_v17 = vpop.permute.xlu0 %381 }
 0xac7   :  { %912 = vmatmul.mubr.msk.f32.vlgmr.msra.gmra.mrb[2].mxu1 %vm73_vm1, %v382_v17 }
 0xac8   :  { %979 = vmatpush3.bf16.msra.mxu1 %v1126_v19  ;;  %933 = vmatprep.mubr.msk.f32.mxu1 %vm1086_vm0, %v1087_v21 }
 0xac9   :  { %980 = vmatprep.subr.bf16.mxu1 %v1085_v18 }
 0xacc   :  { %982 = vmatpush3.bf16.msra.mxu1 %v1134_v22 }
 0xb9a   :  { %v451_v20 = vpop.f32.mrb[2].mxu1 }
 0xb9b   :  { %v456_v23 = vrot.slane %v451_v20, 4  ;;  %v913_v24 = vpop.f32.mrb[3].mxu1  ;;  %v28_v20 = vld [vmem:[#allocation2 + $0x9] sm:$0x1] }
 0xb9d   :  { %v458_v25 = vadd.f32 %v456_v23, %v1120_v6  ;;  %v792_v23 = vrot.slane %v28_v20, 1 }
 0xb9f   :  { %1016 = vtanh.f32 %v458_v25 }
 0xba9   :  { %v1017_v26 = vpop.eup %1016 }
 0xbaa   :  { %467 = vrot.lane.b32.xlu1 %v1017_v26, %s1084_s25  ;;  %v460_v27 = vmul.f32 0.5, %v1017_v26 }
 0xbac   :  { %v461_v28 = vadd.f32 0.5, %v460_v27 }
 0xbae   :  { %v465_v32 = vmul.f32 %v463_v31, %v461_v28 }
 0xc1c   :  { %v468_v29 = vpop.permute.xlu1 %467 }
 0xc1d   :  { %v470_v30 = vmul.f32 %v468_v29, %v461_v28 }
 0xc1f   :  { %472 = vrot.lane.b32.xlu0 %v470_v30, %s1084_s25 }
 0xc91   :  { %v473_v33 = vpop.permute.xlu0 %472 }
 0xc92   :  { %v475_v34 = vadd.f32 %v473_v33, %v465_v32 }
 0xc94   :  { %1018 = vtanh.f32 %v475_v34 }
 0xc9e   :  { %v1019_v35 = vpop.eup %1018 }
 0xc9f   :  { %478 = vrot.lane.b32.xlu1 %v1019_v35, %s1084_s25 }
 0xd11   :  { %v479_v36 = vpop.permute.xlu1 %478 }
 0xd12   :  { %v481_v37 = vmul.f32 %v479_v36, %v461_v28 }
 0xd14   :  { %v483_v38 = vrot.slane %v481_v37, 4 }
 0xd16   :  { %484 = vrot.lane.b32.xlu0 %v483_v38, %s1088_s0 }
 0xd88   :  { %v485_v39 = vpop.permute.xlu0 %484 }
 0xd89   :  { %923 = vmatmul.mubr.msk.f32.vlgmr.msra.gmra.mrb[4].mxu0 %vm73_vm1, %v485_v39 }
 0xd8a   :  { %985 = vmatpush3.bf16.msra.mxu0 %v1126_v19  ;;  %944 = vmatprep.mubr.msk.f32.mxu0 %vm1086_vm0, %v1087_v21  ;;  %v566_v21 = vrot.slane %v475_v34, 7  ;;  %v29_v34 = vld [vmem:[#allocation2 + $0xa] sm:$0x1] }
 0xd8b   :  { %986 = vmatprep.subr.bf16.mxu0 %v1085_v18  ;;  %v806_v35 = vrot.slane %v29_v34, 1 }
 0xd8e   :  { %988 = vmatpush3.bf16.msra.mxu0 %v1134_v22 }
 0xe5c   :  { %v554_v40 = vpop.f32.mrb[4].mxu0 }
 0xe5d   :  { %v559_v41 = vrot.slane %v554_v40, 3  ;;  %v924_v42 = vpop.f32.mrb[5].mxu0 }
 0xe5f   :  { %v561_v43 = vadd.f32 %v559_v41, %v1120_v6 }
 0xe61   :  { %1020 = vtanh.f32 %v561_v43 }
 0xe6b   :  { %v1021_v44 = vpop.eup %1020 }
 0xe6c   :  { %570 = vrot.lane.b32.xlu1 %v1021_v44, %s1084_s25  ;;  %v563_v45 = vmul.f32 0.5, %v1021_v44 }
 0xe6e   :  { %v564_v46 = vadd.f32 0.5, %v563_v45 }
 0xe70   :  { %v568_v48 = vmul.f32 %v566_v21, %v564_v46 }
 0xede   :  { %v571_v47 = vpop.permute.xlu1 %570 }
 0xedf   :  { %v573_v19 = vmul.f32 %v571_v47, %v564_v46 }
 0xee1   :  { %575 = vrot.lane.b32.xlu0 %v573_v19, %s1084_s25 }
 0xf53   :  { %v576_v18 = vpop.permute.xlu0 %575 }
 0xf54   :  { %v578_v49 = vadd.f32 %v576_v18, %v568_v48 }
 0xf56   :  { %1022 = vtanh.f32 %v578_v49  ;;  %v669_v63 = vrot.slane %v578_v49, 7 }
 0xf60   :  { %v1023_v22 = vpop.eup %1022 }
 0xf61   :  { %581 = vrot.lane.b32.xlu1 %v1023_v22, %s1084_s25 }
 0xfd3   :  { %v582_v50 = vpop.permute.xlu1 %581 }
 0xfd4   :  { %v584_v51 = vmul.f32 %v582_v50, %v564_v46 }
 0xfd6   :  { %v586_v52 = vrot.slane %v584_v51, 5 }
 0xfd8   :  { %587 = vrot.lane.b32.xlu0 %v586_v52, %s1088_s0 }
0x104a   :  { %v588_v53 = vpop.permute.xlu0 %587 }
0x104b   :  { %934 = vmatmul.mubr.msk.f32.vlgmr.msra.gmra.mrb[4].mxu1 %vm73_vm1, %v588_v53 }
0x111e   :  { %v657_v54 = vpop.f32.mrb[4].mxu1 }
0x111f   :  { %v662_v55 = vrot.slane %v657_v54, 2  ;;  %v935_v56 = vpop.f32.mrb[5].mxu1 }
0x1121   :  { %v664_v57 = vadd.f32 %v662_v55, %v1120_v6 }
0x1123   :  { %1024 = vtanh.f32 %v664_v57 }
0x112d   :  { %v1025_v58 = vpop.eup %1024 }
0x112e   :  { %673 = vrot.lane.b32.xlu1 %v1025_v58, %s1084_s25  ;;  %v666_v59 = vmul.f32 0.5, %v1025_v58 }
0x1130   :  { %v667_v60 = vadd.f32 0.5, %v666_v59 }
0x1132   :  { %v671_v0 = vmul.f32 %v669_v63, %v667_v60 }
0x11a0   :  { %v674_v61 = vpop.permute.xlu1 %673 }
0x11a1   :  { %v676_v62 = vmul.f32 %v674_v61, %v667_v60 }
0x11a3   :  { %678 = vrot.lane.b32.xlu0 %v676_v62, %s1084_s25 }
0x1215   :  { %v679_v1 = vpop.permute.xlu0 %678 }
0x1216   :  { %v681_v2 = vadd.f32 %v679_v1, %v671_v0 }
0x1218   :  { %1026 = vtanh.f32 %v681_v2  ;;  %v772_v24 = vrot.slane %v681_v2, 7 }
0x1222   :  { %v1027_v3 = vpop.eup %1026 }
0x1223   :  { %684 = vrot.lane.b32.xlu1 %v1027_v3, %s1084_s25 }
0x1295   :  { %v685_v4 = vpop.permute.xlu1 %684 }
0x1296   :  { %v687_v5 = vmul.f32 %v685_v4, %v667_v60 }
0x1298   :  { %v689_v7 = vrot.slane %v687_v5, 6 }
0x129a   :  { %690 = vrot.lane.b32.xlu0 %v689_v7, %s1088_s0 }
0x130c   :  { %v691_v8 = vpop.permute.xlu0 %690 }
0x130d   :  { %945 = vmatmul.mubr.msk.f32.vlgmr.msra.gmra.mrb[6].mxu0 %vm73_vm1, %v691_v8 }
0x13e0   :  { %v760_v9 = vpop.f32.mrb[6].mxu0 }
0x13e1   :  { %v765_v10 = vrot.slane %v760_v9, 1  ;;  %v946_v11 = vpop.f32.mrb[7].mxu0 }
0x13e3   :  { %v767_v12 = vadd.f32 %v765_v10, %v1120_v6 }
0x13e5   :  { %1028 = vtanh.f32 %v767_v12 }
0x13ef   :  { %v1029_v13 = vpop.eup %1028 }
0x13f0   :  { %776 = vrot.lane.b32.xlu1 %v1029_v13, %s1084_s25  ;;  %v769_v14 = vmul.f32 0.5, %v1029_v13 }
0x13f2   :  { %v770_v15 = vadd.f32 0.5, %v769_v14 }
0x13f4   :  { %v774_v25 = vmul.f32 %v772_v24, %v770_v15 }
0x1462   :  { %v777_v16 = vpop.permute.xlu1 %776 }
0x1463   :  { %v779_v17 = vmul.f32 %v777_v16, %v770_v15 }
0x1465   :  { %781 = vrot.lane.b32.xlu0 %v779_v17, %s1084_s25 }
0x1469   :  { %793 = vrot.lane.b32.xlu0 %v792_v23, %s1088_s0 }
0x14d7   :  { %v782_v26 = vpop.permute.xlu0 %781 }
0x14d8   :  { %v784_v27 = vadd.f32 %v782_v26, %v774_v25 }
0x14da   :  { %1030 = vtanh.f32 %v784_v27 }
0x14db   :  { %v794_v29 = vpop.permute.xlu0 %793 }
0x14e4   :  { %v1031_v6 = vpop.eup %1030 }
0x14e5   :  { %787 = vrot.lane.b32.xlu1 %v1031_v6, %s1084_s25 }
0x1557   :  { %v788_v28 = vpop.permute.xlu1 %787 }
0x1558   :  { %v790_v30 = vmul.f32 %v788_v28, %v770_v15 }
0x155a   :  { %v796_v31 = vmul.f32 %v794_v29, %v790_v30 }
0x155c   :  { %798 = vrot.lane.b32.xlu1 %v796_v31, %s1088_s0 }
0x15ce   :  { %v799_v32 = vpop.permute.xlu1 %798 }
0x15cf   :  { %v802_v33 = vsel %vm801_vm2, %v799_v32, 0.0 }
0x15d0   :  { %803 = vadd.xlane.f32.xlu0 %v802_v33 }
0x165d   :  { %v804_v36 = vpop.xlane.xlu0 %803 }
0x165e   :  { %v808_v37 = vadd.f32 %v806_v35, %v804_v36 }
0x1660   :  { %810 = vst.msk [vmem:[#allocation5 - $0x7] sm:$0x80] %vm809_vm3, %v808_v37 }
0x1661   :  { %1065 = shalt.err (!%p1062_p12)
}
0x1662   :  { %s1066_s3 = scalar_lea.hbm %s1230_s2, 16 }
0x1663   :  { %p1067_p13 = scmp.ne.s32.totalorder %s1230_s2, %s1066_s3  ;;  %p1070_p0 = scmp.lt.u32.totalorder %s1066_s3, %s1230_s2 }
0x1665   :  { %p1072_p1 = pnand %p1070_p0, %p1067_p13 }
0x1667   :  { %1075 = shalt.err (!%p1072_p1)
}
0x1668   :  { %820 = dma.vmem_to_hbm [thread:$0]  %s818_s26, 16, %s1230_s2, [#allocation4]  }
0x1669   :  { %1078 = dma.done.wait [#allocation4], 16  }
0x166a   :  { %1079 = vsyncadd [#allocation4], 4294967280 }
0x166b   :  { %824 = vsyncpa [#allocation3], 1 }
0x166c   :  { %825 = vsyncpa [#allocation4], 1 }

</bundles_post_ra>
